<compile_context>
chip_gen: v6e
topology: v6e:2x2x1
jax: 0.10.0
libtpu: 0.0.40
codegen_flags: <defaults>
</compile_context>

<pallas_src>
import functools

import jax
import jax.numpy as jnp
from jax.experimental import pallas as pl
from jax.experimental.pallas import tpu as pltpu


def _fused_mlp_kernel(*refs, num_layers: int, matmul_dtype):
    # refs = (x_ref, w0_ref, b0_ref, w1_ref, b1_ref, ..., o_ref)
    # x_ref: (tile_b, D_in); w_i: (D_in_i, D_out_i) [pre-transposed]; b_i: (1, D_out_i)
    x_ref = refs[0]
    o_ref = refs[-1]
    wb_refs = refs[1:-1]

    h = x_ref[...].astype(jnp.float32)
    for i in range(num_layers):
        w = wb_refs[2 * i][...]
        b = wb_refs[2 * i + 1][...]
        if matmul_dtype is not None:
            lhs = h.astype(matmul_dtype)
            rhs = w.astype(matmul_dtype)
        else:
            lhs, rhs = h, w
        # x @ W  (W already (D_in, D_out): contraction on last dim of lhs /
        # first dim of rhs, no transpose needed), f32 MXU accumulation.
        h = jnp.dot(lhs, rhs, preferred_element_type=jnp.float32)
        h = h + b.astype(jnp.float32)        # bias add in f32 on the VPU
        if i < num_layers - 1:
            h = jnp.maximum(h, 0.0)          # ReLU in f32
    o_ref[...] = h.astype(o_ref.dtype)


def _pick_tile_b(batch: int, max_tile: int = 512) -> int:
    """Batch tile: full batch if small, else a divisor that keeps (8,128) tiling legal."""
    if batch <= max_tile:
        return batch
    for t in (512, 256, 128, 64, 32, 16, 8):
        if batch % t == 0:
            return t
    return batch  # fallback: single block


def fused_mlp_forward(params, x, *, matmul_dtype=jnp.bfloat16, tile_b_max: int = 512):
    """Forward pass matching Model.forward, fully fused into one Pallas kernel.

    params: list of (w, b) with w pre-transposed to (D_in, D_out), b shaped (1, D_out).
    x: (batch, num_points, feature_in) or already-flat (batch, D_in).
    """
    if x.ndim > 2:
        x = x.reshape(x.shape[0], -1)
    batch, d_in = x.shape
    num_layers = len(params)
    d_out_final = params[-1][0].shape[1]

    tile_b = _pick_tile_b(batch, tile_b_max)
    grid = (pl.cdiv(batch, tile_b),)
    vmem = pltpu.MemorySpace.VMEM

    # Input activations: tiled over batch. Weights / biases: full blocks, same for
    # every grid step (kept resident in VMEM by the pipeline).
    in_specs = [pl.BlockSpec((tile_b, d_in), lambda i: (i, 0), memory_space=vmem)]
    flat_wb = []
    for (w, b) in params:
        din_l, dout_l = w.shape
        in_specs.append(
            pl.BlockSpec((din_l, dout_l), lambda i: (0, 0), memory_space=vmem))
        in_specs.append(
            pl.BlockSpec((1, dout_l), lambda i: (0, 0), memory_space=vmem))
        flat_wb.extend((w, b))

    out_specs = pl.BlockSpec((tile_b, d_out_final), lambda i: (i, 0), memory_space=vmem)
    # TODO(synk): at realistic sizes, pad hidden/output widths to multiples of 128
    # lanes to avoid masked partial stores (perf only; correctness unaffected).

    kernel = functools.partial(
        _fused_mlp_kernel, num_layers=num_layers, matmul_dtype=matmul_dtype)

    return pl.pallas_call(
        kernel,
        out_shape=jax.ShapeDtypeStruct((batch, d_out_final), x.dtype),
        grid=grid,
        in_specs=in_specs,
        out_specs=out_specs,
        compiler_params=pltpu.CompilerParams(
            dimension_semantics=("parallel",)),  # batch tiles shard across TCs (v7x)
    )(x, *flat_wb)


def init_params(key, feature_in, num_points, num_classes, num_layers=4, hidden_dim=64):
    """nn.Linear-style init; weights stored PRE-TRANSPOSED as (D_in, D_out),
    biases stored as (1, D_out) so the kernel needs no transpose/reshape."""
    dims = [feature_in * num_points] + [hidden_dim] * (num_layers - 1) + [num_classes]
    params = []
    for i in range(num_layers):
        key, kw, kb = jax.random.split(key, 3)
        fan_in = dims[i]
        bound = 1.0 / (fan_in ** 0.5)
        w = jax.random.uniform(kw, (dims[i], dims[i + 1]), jnp.float32, -bound, bound)
        b = jax.random.uniform(kb, (1, dims[i + 1]), jnp.float32, -bound, bound)
        params.append((w, b))
    return params


if __name__ == "__main__":
    # Small shapes consistent with the module's forward contract.
    batch = 2
    num_points = 8
    feature_in = 4
    num_classes = 8
    num_layers = 4
    hidden_dim = 32

    key = jax.random.PRNGKey(0)
    key, kx = jax.random.split(key)
    x = jax.random.normal(kx, (batch, num_points, feature_in), jnp.float32)

    params = init_params(key, feature_in, num_points, num_classes,
                         num_layers=num_layers, hidden_dim=hidden_dim)

    matmul_dtype = jnp.bfloat16
    out = fused_mlp_forward(params, x, matmul_dtype=matmul_dtype)
    out = jax.block_until_ready(out)

    # Pure-JAX reference using the SAME bf16-operand / f32-accumulate math.
    ref = x.reshape(batch, -1)
    for i, (w, b) in enumerate(params):
        y = jnp.dot(ref.astype(matmul_dtype), w.astype(matmul_dtype),
                    preferred_element_type=jnp.float32) + b
        ref = jnp.maximum(y, 0.0) if i < num_layers - 1 else y

    assert out.shape == (batch, num_classes)
    assert jnp.allclose(out, ref, atol=1e-2, rtol=1e-2), "mismatch vs reference"
    print("KERNEL_OK")
</pallas_src>

<mosaic_0001>
module attributes {stable_mosaic.version = 11 : i64} {
  func.func @_fused_mlp_kernel(%arg0: i32, %arg1: memref<2x32xf32, #tpu.memory_space<vmem>>, %arg2: memref<32x32xf32, #tpu.memory_space<vmem>>, %arg3: memref<1x32xf32, #tpu.memory_space<vmem>>, %arg4: memref<32x32xf32, #tpu.memory_space<vmem>>, %arg5: memref<1x32xf32, #tpu.memory_space<vmem>>, %arg6: memref<32x32xf32, #tpu.memory_space<vmem>>, %arg7: memref<1x32xf32, #tpu.memory_space<vmem>>, %arg8: memref<32x8xf32, #tpu.memory_space<vmem>>, %arg9: memref<1x8xf32, #tpu.memory_space<vmem>>, %arg10: memref<2x8xf32, #tpu.memory_space<vmem>>) attributes {dimension_semantics = [#tpu.dimension_semantics<parallel>], iteration_bounds = array<i64: 1>, scalar_prefetch = 0 : i64, scratch_operands = 0 : i64, tpu.core_type = #tpu.core_type<tc>, window_params = [{transform_indices = @transform_0, window_bounds = array<i64: 2, 32>}, {pipeline_mode = #tpu.pipeline_mode<synchronous>, transform_indices = @transform_1, window_bounds = array<i64: 32, 32>}, {pipeline_mode = #tpu.pipeline_mode<synchronous>, transform_indices = @transform_2, window_bounds = array<i64: 1, 32>}, {pipeline_mode = #tpu.pipeline_mode<synchronous>, transform_indices = @transform_3, window_bounds = array<i64: 32, 32>}, {pipeline_mode = #tpu.pipeline_mode<synchronous>, transform_indices = @transform_4, window_bounds = array<i64: 1, 32>}, {pipeline_mode = #tpu.pipeline_mode<synchronous>, transform_indices = @transform_5, window_bounds = array<i64: 32, 32>}, {pipeline_mode = #tpu.pipeline_mode<synchronous>, transform_indices = @transform_6, window_bounds = array<i64: 1, 32>}, {pipeline_mode = #tpu.pipeline_mode<synchronous>, transform_indices = @transform_7, window_bounds = array<i64: 32, 8>}, {pipeline_mode = #tpu.pipeline_mode<synchronous>, transform_indices = @transform_8, window_bounds = array<i64: 1, 8>}, {transform_indices = @transform_9, window_bounds = array<i64: 2, 8>}]} {
    %c0 = arith.constant 0 : index
    %c0_0 = arith.constant 0 : index
    %0 = vector.load %arg1[%c0, %c0_0] : memref<2x32xf32, #tpu.memory_space<vmem>>, vector<2x32xf32>
    %c0_1 = arith.constant 0 : index
    %c0_2 = arith.constant 0 : index
    %1 = vector.load %arg2[%c0_1, %c0_2] : memref<32x32xf32, #tpu.memory_space<vmem>>, vector<32x32xf32>
    %c0_3 = arith.constant 0 : index
    %c0_4 = arith.constant 0 : index
    %2 = vector.load %arg3[%c0_3, %c0_4] : memref<1x32xf32, #tpu.memory_space<vmem>>, vector<1x32xf32>
    %3 = arith.truncf %0 : vector<2x32xf32> to vector<2x32xbf16>
    %4 = arith.truncf %1 : vector<32x32xf32> to vector<32x32xbf16>
    %cst = arith.constant dense<0.000000e+00> : vector<2x32xf32>
    %5 = tpu.matmul %3, %4, %cst {dimension_numbers = #tpu.dot_dimension_numbers<[1], [0], [0], [1], [0, 0, 1, 1], [], []>} : vector<2x32xbf16>, vector<32x32xbf16>, vector<2x32xf32> -> vector<2x32xf32>
    %6 = vector.broadcast %2 : vector<1x32xf32> to vector<2x32xf32>
    %7 = arith.addf %5, %6 : vector<2x32xf32>
    %cst_5 = arith.constant 0.000000e+00 : f32
    %8 = vector.broadcast %cst_5 : f32 to vector<2x32xf32>
    %9 = arith.maximumf %7, %8 : vector<2x32xf32>
    %c0_6 = arith.constant 0 : index
    %c0_7 = arith.constant 0 : index
    %10 = vector.load %arg4[%c0_6, %c0_7] : memref<32x32xf32, #tpu.memory_space<vmem>>, vector<32x32xf32>
    %c0_8 = arith.constant 0 : index
    %c0_9 = arith.constant 0 : index
    %11 = vector.load %arg5[%c0_8, %c0_9] : memref<1x32xf32, #tpu.memory_space<vmem>>, vector<1x32xf32>
    %12 = arith.truncf %9 : vector<2x32xf32> to vector<2x32xbf16>
    %13 = arith.truncf %10 : vector<32x32xf32> to vector<32x32xbf16>
    %cst_10 = arith.constant dense<0.000000e+00> : vector<2x32xf32>
    %14 = tpu.matmul %12, %13, %cst_10 {dimension_numbers = #tpu.dot_dimension_numbers<[1], [0], [0], [1], [0, 0, 1, 1], [], []>} : vector<2x32xbf16>, vector<32x32xbf16>, vector<2x32xf32> -> vector<2x32xf32>
    %15 = vector.broadcast %11 : vector<1x32xf32> to vector<2x32xf32>
    %16 = arith.addf %14, %15 : vector<2x32xf32>
    %cst_11 = arith.constant 0.000000e+00 : f32
    %17 = vector.broadcast %cst_11 : f32 to vector<2x32xf32>
    %18 = arith.maximumf %16, %17 : vector<2x32xf32>
    %c0_12 = arith.constant 0 : index
    %c0_13 = arith.constant 0 : index
    %19 = vector.load %arg6[%c0_12, %c0_13] : memref<32x32xf32, #tpu.memory_space<vmem>>, vector<32x32xf32>
    %c0_14 = arith.constant 0 : index
    %c0_15 = arith.constant 0 : index
    %20 = vector.load %arg7[%c0_14, %c0_15] : memref<1x32xf32, #tpu.memory_space<vmem>>, vector<1x32xf32>
    %21 = arith.truncf %18 : vector<2x32xf32> to vector<2x32xbf16>
    %22 = arith.truncf %19 : vector<32x32xf32> to vector<32x32xbf16>
    %cst_16 = arith.constant dense<0.000000e+00> : vector<2x32xf32>
    %23 = tpu.matmul %21, %22, %cst_16 {dimension_numbers = #tpu.dot_dimension_numbers<[1], [0], [0], [1], [0, 0, 1, 1], [], []>} : vector<2x32xbf16>, vector<32x32xbf16>, vector<2x32xf32> -> vector<2x32xf32>
    %24 = vector.broadcast %20 : vector<1x32xf32> to vector<2x32xf32>
    %25 = arith.addf %23, %24 : vector<2x32xf32>
    %cst_17 = arith.constant 0.000000e+00 : f32
    %26 = vector.broadcast %cst_17 : f32 to vector<2x32xf32>
    %27 = arith.maximumf %25, %26 : vector<2x32xf32>
    %c0_18 = arith.constant 0 : index
    %c0_19 = arith.constant 0 : index
    %28 = vector.load %arg8[%c0_18, %c0_19] : memref<32x8xf32, #tpu.memory_space<vmem>>, vector<32x8xf32>
    %c0_20 = arith.constant 0 : index
    %c0_21 = arith.constant 0 : index
    %29 = vector.load %arg9[%c0_20, %c0_21] : memref<1x8xf32, #tpu.memory_space<vmem>>, vector<1x8xf32>
    %30 = arith.truncf %27 : vector<2x32xf32> to vector<2x32xbf16>
    %31 = arith.truncf %28 : vector<32x8xf32> to vector<32x8xbf16>
    %cst_22 = arith.constant dense<0.000000e+00> : vector<2x8xf32>
    %32 = tpu.matmul %30, %31, %cst_22 {dimension_numbers = #tpu.dot_dimension_numbers<[1], [0], [0], [1], [0, 0, 1, 1], [], []>} : vector<2x32xbf16>, vector<32x8xbf16>, vector<2x8xf32> -> vector<2x8xf32>
    %33 = vector.broadcast %29 : vector<1x8xf32> to vector<2x8xf32>
    %34 = arith.addf %32, %33 : vector<2x8xf32>
    %c0_23 = arith.constant 0 : index
    %c0_24 = arith.constant 0 : index
    %35 = vector.load %arg10[%c0_23, %c0_24] : memref<2x8xf32, #tpu.memory_space<vmem>>, vector<2x8xf32>
    tpu.vector_store %arg10[%c0_23, %c0_24], %34 {strides = array<i32>} : memref<2x8xf32, #tpu.memory_space<vmem>>, vector<2x8xf32>,
    return
  }
  func.func @transform_0(%arg0: i32) -> (i32, i32) {
    %c0_i32 = arith.constant 0 : i32
    %c0_i32_0 = arith.constant 0 : i32
    return %arg0, %c0_i32 : i32, i32
  }
  func.func @transform_1(%arg0: i32) -> (i32, i32) {
    %c0_i32 = arith.constant 0 : i32
    %c0_i32_0 = arith.constant 0 : i32
    %c0_i32_1 = arith.constant 0 : i32
    return %c0_i32, %c0_i32_0 : i32, i32
  }
  func.func @transform_2(%arg0: i32) -> (i32, i32) {
    %c0_i32 = arith.constant 0 : i32
    %c0_i32_0 = arith.constant 0 : i32
    %c0_i32_1 = arith.constant 0 : i32
    return %c0_i32, %c0_i32_0 : i32, i32
  }
  func.func @transform_3(%arg0: i32) -> (i32, i32) {
    %c0_i32 = arith.constant 0 : i32
    %c0_i32_0 = arith.constant 0 : i32
    %c0_i32_1 = arith.constant 0 : i32
    return %c0_i32, %c0_i32_0 : i32, i32
  }
  func.func @transform_4(%arg0: i32) -> (i32, i32) {
    %c0_i32 = arith.constant 0 : i32
    %c0_i32_0 = arith.constant 0 : i32
    %c0_i32_1 = arith.constant 0 : i32
    return %c0_i32, %c0_i32_0 : i32, i32
  }
  func.func @transform_5(%arg0: i32) -> (i32, i32) {
    %c0_i32 = arith.constant 0 : i32
    %c0_i32_0 = arith.constant 0 : i32
    %c0_i32_1 = arith.constant 0 : i32
    return %c0_i32, %c0_i32_0 : i32, i32
  }
  func.func @transform_6(%arg0: i32) -> (i32, i32) {
    %c0_i32 = arith.constant 0 : i32
    %c0_i32_0 = arith.constant 0 : i32
    %c0_i32_1 = arith.constant 0 : i32
    return %c0_i32, %c0_i32_0 : i32, i32
  }
  func.func @transform_7(%arg0: i32) -> (i32, i32) {
    %c0_i32 = arith.constant 0 : i32
    %c0_i32_0 = arith.constant 0 : i32
    %c0_i32_1 = arith.constant 0 : i32
    return %c0_i32, %c0_i32_0 : i32, i32
  }
  func.func @transform_8(%arg0: i32) -> (i32, i32) {
    %c0_i32 = arith.constant 0 : i32
    %c0_i32_0 = arith.constant 0 : i32
    %c0_i32_1 = arith.constant 0 : i32
    return %c0_i32, %c0_i32_0 : i32, i32
  }
  func.func @transform_9(%arg0: i32) -> (i32, i32) {
    %c0_i32 = arith.constant 0 : i32
    %c0_i32_0 = arith.constant 0 : i32
    return %arg0, %c0_i32 : i32, i32
  }
}

</mosaic_0001>

<bundles_post_ra>
// kernel: tpu_custom_call.1
= control target key start
LH: loop header
LB: loop body
LE: loop exit
PB: predicated region body
PF: predicated region fallthrough
CT: control target
= control target key end

     0   :  { %14 = vsyncpa [#allocation3], 0  ;;  %s551_s0 = inlined_call_operand.vmem [shape: f32[2,32], index: 0, kind: input, shape index: {}]   ;;  %s552_s1 = inlined_call_operand.vmem [shape: f32[32,32], index: 1, kind: input, shape index: {}]   ;;  %s553_s2 = inlined_call_operand.vmem [shape: f32[1,32], index: 2, kind: input, shape index: {}]   ;;  %s554_s3 = inlined_call_operand.hbm [shape: f32[32,32], index: 3, kind: input, shape index: {}]   ;;  %s555_s4 = inlined_call_operand.vmem [shape: f32[1,32], index: 4, kind: input, shape index: {}]   ;;  %s556_s5 = inlined_call_operand.hbm [shape: f32[32,32], index: 5, kind: input, shape index: {}]   ;;  %s557_s6 = inlined_call_operand.vmem [shape: f32[1,32], index: 6, kind: input, shape index: {}]   ;;  %s558_s7 = inlined_call_operand.vmem [shape: f32[32,8], index: 7, kind: input, shape index: {}]   ;;  %s559_s8 = inlined_call_operand.vmem [shape: f32[1,8], index: 8, kind: input, shape index: {}]   ;;  %s560_s9 = inlined_call_operand.hbm [shape: f32[2,8], index: 9, kind: output, shape index: {}]  }
   0x1   :  { %15 = vsyncpa [#allocation6], 0 }
   0x2   :  { %16 = vsyncpa [#allocation4], 0  ;;  %s438_s30 = smov [#allocation2]  }
   0x3   :  { %s28_s10 = sshll.u32 %s438_s30, 4  ;;  %s29_s10 = int_to_ptr.vmem [resolvable:$true] %s28_s10 }
   0x4   :  { %s380_s11 = scalar_lea.vmem %s29_s10, 512  ;;  %p385_p1 = scmp.lt.s32.totalorder %s29_s10, %s29_s10 }
   0x5   :  { %p381_p0 = scmp.ne.s32.totalorder %s29_s10, %s380_s11  ;;  %p386_p2 = scmp.lt.s32.totalorder %s380_s11, %s380_s11 }
   0x7   :  { %p387_p3 = por %p386_p2, %p385_p1 }
   0x9   :  { %p388_p4 = pnand %p387_p3, %p381_p0 }
   0xb   :  { %391 = shalt.err (!%p388_p4)
}
   0xc   :  { %s439_s12 = smov 128   ;;  %s440_s13 = smov 8  }
   0xd   :  { %34 = dma.hbm_to_vmem [thread:$0]  %s554_s3, 512, %s29_s10, [#allocation3], %s439_s12, %s439_s12, %s440_s13  }
   0xe   :  { %s441_s16 = smov [#allocation5]  }
   0xf   :  { %s42_s17 = sshll.u32 %s441_s16, 4  ;;  %s43_s17 = int_to_ptr.vmem [resolvable:$true] %s42_s17 }
  0x10   :  { %s400_s18 = scalar_lea.vmem %s43_s17, 512  ;;  %p405_p6 = scmp.lt.s32.totalorder %s43_s17, %s43_s17 }
  0x11   :  { %p401_p5 = scmp.ne.s32.totalorder %s43_s17, %s400_s18  ;;  %p406_p7 = scmp.lt.s32.totalorder %s400_s18, %s400_s18 }
  0x13   :  { %p407_p8 = por %p406_p7, %p405_p6 }
  0x15   :  { %p408_p9 = pnand %p407_p8, %p401_p5 }
  0x17   :  { %411 = shalt.err (!%p408_p9)
}
  0x18   :  { %48 = dma.hbm_to_vmem [thread:$0]  %s556_s5, 512, %s43_s17, [#allocation6], %s439_s12, %s439_s12, %s440_s13  }
  0x19   :  { %432 = dma.done.wait [#allocation3], 512  }
  0x1a   :  { %433 = vsyncadd [#allocation3], 4294966784 }
  0x1b   :  { %434 = dma.done.wait [#allocation6], 512  }
  0x1c   :  { %435 = vsyncadd [#allocation6], 4294966784  ;;  %v442_v0 = vmov 0.0   ;;  %vm443_vm0 = vmmov 0   ;;  %v65_v1 = vld [vmem:[%s552_s1 + $0x10] sm:$0xff]  ;;  %v66_v2 = vld [vmem:[%s552_s1 + $0x18] sm:$0xff] }
  0x1d   :  { %333 = vmatprep.subr.bf16.mxu0 %v442_v0  ;;  %337 = vmatprep.mubr.msk.bf16.mxu0 %vm443_vm0, %v442_v0  ;;  %v63_v3 = vld [vmem:[%s552_s1] sm:$0xff]  ;;  %v70_v4 = vpack.c.bf16 %v66_v2, %v65_v1  ;;  %v64_v5 = vld [vmem:[%s552_s1 + $0x8] sm:$0xff]  ;;  %vm77_vm1 = vcmask 261120   ;;  %v124_v9 = vld [vmem:[#allocation2 + $0x10] sm:$0xff]  ;;  %vm295_vm2 = vcmask 58368  }
  0x1e   :  { %341 = vmatprep.subr.bf16.mxu1 %v442_v0  ;;  %345 = vmatprep.mubr.msk.bf16.mxu1 %vm443_vm0, %v442_v0  ;;  %v69_v6 = vpack.c.bf16 %v64_v5, %v63_v3  ;;  %v62_v7 = vld [vmem:[%s551_s0] sm:$0x3]  ;;  %v125_v10 = vld [vmem:[#allocation2 + $0x18] sm:$0xff]  ;;  %v123_v13 = vld [vmem:[#allocation2 + $0x8] sm:$0xff] }
  0x1f   :  { %334 = vmatpush3.bf16.msra.mxu0 %v70_v4  ;;  %v68_v8 = vpack.c.bf16 %v62_v7, %v62_v7  ;;  %v129_v11 = vpack.c.bf16 %v125_v10, %v124_v9  ;;  %v122_v12 = vld [vmem:[#allocation2] sm:$0xff]  ;;  %v182_v15 = vld [vmem:[#allocation5 + $0x10] sm:$0xff]  ;;  %v183_v16 = vld [vmem:[#allocation5 + $0x18] sm:$0xff] }
  0x20   :  { %335 = vmatprep.subr.bf16.mxu0 %v442_v0  ;;  %v128_v14 = vpack.c.bf16 %v123_v13, %v122_v12  ;;  %v187_v17 = vpack.c.bf16 %v183_v16, %v182_v15  ;;  %v313_v18 = vld [vmem:[%s553_s2] ss:$0 sm:$0xff]  ;;  %v181_v27 = vld [vmem:[#allocation5 + $0x8] sm:$0xff]  ;;  %v240_v29 = vld [vmem:[%s558_s7 + $0x10] sm:$0xff] }
  0x21   :  { %342 = vmatpush3.bf16.msra.mxu1 %v129_v11  ;;  %v180_v26 = vld [vmem:[#allocation5] sm:$0xff]  ;;  %v241_v30 = vld [vmem:[%s558_s7 + $0x18] sm:$0xff]  ;;  %v239_v41 = vld [vmem:[%s558_s7 + $0x8] sm:$0xff] }
  0x22   :  { %343 = vmatprep.subr.bf16.mxu1 %v442_v0  ;;  %v186_v28 = vpack.c.bf16 %v181_v27, %v180_v26  ;;  %v245_v31 = vpack.c.bf16 %v241_v30, %v240_v29  ;;  %v315_v32 = vld [vmem:[%s555_s4] ss:$0 sm:$0xff] }
  0x23   :  { %336 = vmatpush3.bf16.msra.mxu0 %v69_v6  ;;  %v238_v40 = vld [vmem:[%s558_s7] sm:$0xff]  ;;  %s444_s7 = smov [#allocation7]  }
  0x24   :  { %349 = vmatprep.subr.bf16.mxu0 %v442_v0  ;;  %v244_v42 = vpack.c.bf16 %v239_v41, %v238_v40  ;;  %v317_v43 = vld [vmem:[%s557_s6] ss:$0 sm:$0xff]  ;;  %s303_s20 = sshll.u32 %s444_s7, 4  ;;  %s304_s20 = int_to_ptr.vmem [resolvable:$true] %s303_s20 }
  0x25   :  { %344 = vmatpush3.bf16.msra.mxu1 %v128_v14  ;;  %v319_v51 = vld [vmem:[%s559_s8] ss:$0 sm:$0xff]  ;;  %s412_s6 = scalar_lea.vmem %s304_s20, 32  ;;  %p417_p11 = scmp.lt.s32.totalorder %s304_s20, %s304_s20 }
  0x26   :  { %338 = vmatmul.mubr.msk.bf16.vlgmr.msra.gmra.mxu0 %vm77_vm1, %v68_v8  ;;  %357 = vmatprep.subr.bf16.mxu1 %v442_v0  ;;  %p413_p10 = scmp.ne.s32.totalorder %s304_s20, %s412_s6  ;;  %p418_p12 = scmp.lt.s32.totalorder %s412_s6, %s412_s6 }
  0x27   :  { %353 = vmatprep.mubr.msk.bf16.mxu0 %vm443_vm0, %v442_v0  ;;  %350 = vmatpush3.bf16.msra.mxu0 %v187_v17 }
  0x28   :  { %351 = vmatprep.subr.bf16.mxu0 %v442_v0  ;;  %p419_p13 = por %p418_p12, %p417_p11 }
  0x2a   :  { %p420_p0 = pnand %p419_p13, %p413_p10 }
  0x2b   :  { %352 = vmatpush3.bf16.msra.mxu0 %v186_v28 }
  0xe6   :  { %v115_v19 = vpop.f32.mrf.mxu0 }
  0xe7   :  { %v116_v20 = vadd.f32 %v313_v18, %v115_v19 }
  0xe8   :  { %v339_v21 = vpop.f32.mrf.mxu0 }
  0xe9   :  { %v121_v22 = vmax.f32 %v116_v20, 0.0 }
  0xea   :  { %v118_v23 = vpop.f32.mrf.mxu0 }
  0xeb   :  { %v127_v24 = vpack.c.bf16 %v121_v22, %v121_v22 }
  0xec   :  { %v340_v25 = vpop.f32.mrf.mxu0 }
  0xed   :  { %346 = vmatmul.mubr.msk.bf16.vlgmr.msra.gmra.mxu1 %vm77_vm1, %v127_v24 }
  0xee   :  { %361 = vmatprep.mubr.msk.bf16.mxu1 %vm443_vm0, %v442_v0  ;;  %358 = vmatpush3.bf16.msra.mxu1 %v245_v31 }
  0xef   :  { %359 = vmatprep.subr.bf16.mxu1 %v442_v0 }
  0xf2   :  { %360 = vmatpush3.bf16.msra.mxu1 %v244_v42 }
 0x1ad   :  { %v173_v33 = vpop.f32.mrf.mxu1 }
 0x1ae   :  { %v174_v34 = vadd.f32 %v315_v32, %v173_v33 }
 0x1af   :  { %v347_v35 = vpop.f32.mrf.mxu1 }
 0x1b0   :  { %v179_v36 = vmax.f32 %v174_v34, 0.0 }
 0x1b1   :  { %v176_v37 = vpop.f32.mrf.mxu1 }
 0x1b2   :  { %v185_v38 = vpack.c.bf16 %v179_v36, %v179_v36 }
 0x1b3   :  { %v348_v39 = vpop.f32.mrf.mxu1 }
 0x1b4   :  { %354 = vmatmul.mubr.msk.bf16.vlgmr.msra.gmra.mxu0 %vm77_vm1, %v185_v38 }
 0x274   :  { %v231_v44 = vpop.f32.mrf.mxu0 }
 0x275   :  { %v232_v45 = vadd.f32 %v317_v43, %v231_v44 }
 0x276   :  { %v355_v46 = vpop.f32.mrf.mxu0 }
 0x277   :  { %v237_v47 = vmax.f32 %v232_v45, 0.0 }
 0x278   :  { %v234_v48 = vpop.f32.mrf.mxu0 }
 0x279   :  { %v243_v49 = vpack.c.bf16 %v237_v47, %v237_v47 }
 0x27a   :  { %v356_v50 = vpop.f32.mrf.mxu0 }
 0x27b   :  { %362 = vmatmul.mubr.msk.bf16.vlgmr.msra.gmra.mxu1 %vm77_vm1, %v243_v49 }
 0x33b   :  { %v289_v52 = vpop.f32.mrf.mxu1 }
 0x33c   :  { %v290_v53 = vadd.f32 %v319_v51, %v289_v52 }
 0x33d   :  { %v363_v54 = vpop.f32.mrf.mxu1 }
 0x33e   :  { %296 = vst.msk [vmem:[#allocation7] sm:$0x3] %vm295_vm2, %v290_v53 }
 0x33f   :  { %v292_v55 = vpop.f32.mrf.mxu1 }
 0x340   :  { %423 = shalt.err (!%p420_p0)
}
 0x341   :  { %306 = dma.vmem_to_hbm [thread:$0]  %s304_s20, 32, %s560_s9, [#allocation4]   ;;  %v364_v56 = vpop.f32.mrf.mxu1 }
 0x342   :  { %436 = dma.done.wait [#allocation4], 32  }
 0x343   :  { %437 = vsyncadd [#allocation4], 4294967264 }
 0x344   :  { %310 = vsyncpa [#allocation3], 1 }
 0x345   :  { %311 = vsyncpa [#allocation6], 1 }
 0x346   :  { %312 = vsyncpa [#allocation4], 1 }

</bundles_post_ra>
